<compile_context>
chip_gen: v7x
topology: tpu7x:2x2x1
jax: 0.10.0
libtpu: 0.0.40
codegen_flags: <defaults>
</compile_context>

<pallas_src>
import functools

import jax
import jax.numpy as jnp
from jax import lax
from jax.experimental import pallas as pl
from jax.experimental.pallas import tpu as pltpu


# ----------------------------------------------------------------------------
# Pallas kernel: one (sample n, query-row block i) tile per grid step.
# ----------------------------------------------------------------------------
def _cobi_kernel(x_ref, yt_ref, cxsp_ref, out_ref, acc_ref,
                 *, band_width, weight_sp, hw):
    i = pl.program_id(1)

    @pl.when(i == 0)
    def _():
        acc_ref[...] = jnp.zeros_like(acc_ref)

    x_blk = x_ref[0]          # (TI, C)  bf16, rows already L2-normalized
    y_t = yt_ref[0]           # (C, HW)  bf16, cols already L2-normalized
    cx_sp = cxsp_ref[...]     # (TI, HW) f32, precomputed spatial softmax rows

    # cosine similarity on the MXU, f32 accumulate.
    cos = jnp.dot(x_blk, y_t, preferred_element_type=jnp.float32)   # (TI, HW)
    dist = 1.0 - cos

    # relative distance + contextual softmax (feature branch only).
    d_min = jnp.min(dist, axis=-1, keepdims=True)                   # (TI, 1)
    inv_dmin = pl.reciprocal(d_min + 1e-5, approx=True)              # EUP
    w = jnp.exp((1.0 - dist * inv_dmin) * (1.0 / band_width))        # (TI, HW)
    inv_wsum = pl.reciprocal(jnp.sum(w, axis=-1, keepdims=True), approx=True)

    # combine with the precomputed spatial branch and reduce; the (1 - ws)
    # scale is folded into the row reciprocal so cx_feat is never stored.
    k_max = jnp.max(w * ((1.0 - weight_sp) * inv_wsum) + weight_sp * cx_sp,
                    axis=-1, keepdims=True)                          # (TI, 1)
    acc_ref[...] += jnp.sum(k_max, axis=0, keepdims=True)            # (1, 1)

    @pl.when(i == pl.num_programs(1) - 1)
    def _():
        cx = acc_ref[...] * (1.0 / hw)                               # mean over i
        out_ref[0] = -jnp.log(cx + 1e-5)                             # (1, 1)


def _row_tile(hw):
    for t in (256, 128, 64, 32, 16, 8):
        if hw % t == 0:
            return t
    return hw  # odd HW: fall back to a single full-extent row block


def cobi_loss_pallas(pred_feat, target_feat, *, band_width=0.5, weight_sp=0.1):
    """cobi_loss(pred_feat, target_feat, loss_type='cosine', reduction='mean')."""
    N, C, H, W = pred_feat.shape
    HW = H * W
    TI = _row_tile(HW)

    pred_feat = pred_feat.astype(jnp.float32)
    target_feat = target_feat.astype(jnp.float32)

    # --- XLA glue: centering + channel-wise L2 normalization (F.normalize) ---
    y_mu = jnp.mean(target_feat, axis=(0, 2, 3), keepdims=True)
    xc = (pred_feat - y_mu).reshape(N, C, HW)
    yc = (target_feat - y_mu).reshape(N, C, HW)
    x_nrm = jnp.maximum(jnp.sqrt(jnp.sum(xc * xc, axis=1, keepdims=True)), 1e-12)
    y_nrm = jnp.maximum(jnp.sqrt(jnp.sum(yc * yc, axis=1, keepdims=True)), 1e-12)
    x_n = jnp.transpose(xc / x_nrm, (0, 2, 1)).astype(jnp.bfloat16)   # (N, HW, C)
    y_nt = (yc / y_nrm).astype(jnp.bfloat16)                          # (N, C, HW)

    # --- XLA glue: spatial contextual softmax cx_sp (batch-invariant) ---
    rows = jnp.arange(H, dtype=jnp.float32) / (H + 1)
    cols = jnp.arange(W, dtype=jnp.float32) / (W + 1)
    rr, cc = jnp.meshgrid(rows, cols, indexing="ij")
    coords = jnp.stack([rr.reshape(-1), cc.reshape(-1)], axis=-1)     # (HW, 2)
    diff = coords[:, None, :] - coords[None, :, :]
    d2 = jnp.maximum(jnp.sum(diff * diff, axis=-1), 0.0)              # (HW, HW)
    d2_min = jnp.min(d2, axis=-1, keepdims=True)
    w_sp = jnp.exp((1.0 - d2 / (d2_min + 1e-5)) / band_width)
    cx_sp = w_sp / jnp.sum(w_sp, axis=-1, keepdims=True)              # (HW, HW) f32

    kernel = functools.partial(_cobi_kernel,
                               band_width=float(band_width),
                               weight_sp=float(weight_sp),
                               hw=float(HW))

    per_sample = pl.pallas_call(
        kernel,
        out_shape=jax.ShapeDtypeStruct((N, 1, 1), jnp.float32),
        grid_spec=pltpu.PrefetchScalarGridSpec(
            num_scalar_prefetch=0,
            grid=(N, HW // TI),
            in_specs=[
                pl.BlockSpec((1, TI, C), lambda n, i: (n, i, 0)),   # x rows
                pl.BlockSpec((1, C, HW), lambda n, i: (n, 0, 0)),   # y resident
                pl.BlockSpec((TI, HW), lambda n, i: (i, 0)),        # cx_sp rows
            ],
            out_specs=pl.BlockSpec((1, 1, 1), lambda n, i: (n, 0, 0)),
            scratch_shapes=[pltpu.VMEM((1, 1), jnp.float32)],
        ),
        compiler_params=pltpu.CompilerParams(
            dimension_semantics=("parallel", "arbitrary"),
            vmem_limit_bytes=48 * 1024 * 1024),
    )(x_n, y_nt, cx_sp)

    # @weighted_loss with weight=None, reduction='mean'
    return jnp.mean(per_sample)


# ----------------------------------------------------------------------------
# VGG19 -> conv4_4 feature extractor (glue, plain JAX).
# ----------------------------------------------------------------------------
_VGG19_TO_CONV4_4 = [
    ("conv", 3, 64), ("conv", 64, 64), ("pool",),
    ("conv", 64, 128), ("conv", 128, 128), ("pool",),
    ("conv", 128, 256), ("conv", 256, 256), ("conv", 256, 256), ("conv", 256, 256), ("pool",),
    ("conv", 256, 512), ("conv", 512, 512), ("conv", 512, 512), ("conv", 512, 512),
]

_IMAGENET_MEAN = jnp.array([0.485, 0.456, 0.406], jnp.float32).reshape(1, 3, 1, 1)
_IMAGENET_STD = jnp.array([0.229, 0.224, 0.225], jnp.float32).reshape(1, 3, 1, 1)


def init_vgg_params(key):
    # TODO(synk): the real CoBiLoss loads pretrained torchvision vgg19 weights;
    # here we use deterministic He-scaled random weights of identical shapes.
    params = []
    for layer in _VGG19_TO_CONV4_4:
        if layer[0] == "conv":
            _, cin, cout = layer
            key, sub = jax.random.split(key)
            w = jax.random.normal(sub, (cout, cin, 3, 3), jnp.float32)
            w = w * jnp.sqrt(2.0 / (cin * 9))
            b = jnp.zeros((cout,), jnp.float32)
            params.append((w, b))
        else:
            params.append(())
    return params


def vgg_conv4_4_features(params, x):
    # x: (N, 3, H, W) in [0, 1], NCHW.
    x = (x - _IMAGENET_MEAN) / _IMAGENET_STD
    n_conv = sum(1 for l in _VGG19_TO_CONV4_4 if l[0] == "conv")
    conv_idx = 0
    for layer, p in zip(_VGG19_TO_CONV4_4, params):
        if layer[0] == "conv":
            w, b = p
            x = lax.conv_general_dilated(
                x, w, window_strides=(1, 1), padding=((1, 1), (1, 1)),
                dimension_numbers=("NCHW", "OIHW", "NCHW"))
            x = x + b.reshape(1, -1, 1, 1)
            conv_idx += 1
            if conv_idx < n_conv:          # conv4_4 output taken before its ReLU
                x = jax.nn.relu(x)
        else:
            x = lax.reduce_window(x, -jnp.inf, lax.max,
                                  window_dimensions=(1, 1, 2, 2),
                                  window_strides=(1, 1, 2, 2),
                                  padding="VALID")
    return x


# ----------------------------------------------------------------------------
# CoBiLoss.forward equivalent.
# ----------------------------------------------------------------------------
def cobi_loss_forward(params, pred, target, *, band_width=0.5, weight_sp=0.1,
                      loss_weight=1.0):
    pred_f = vgg_conv4_4_features(params, pred)
    target_f = vgg_conv4_4_features(params, lax.stop_gradient(target))
    cx_loss = cobi_loss_pallas(pred_f, target_f,
                               band_width=band_width, weight_sp=weight_sp)
    return cx_loss * loss_weight


if __name__ == "__main__":
    key = jax.random.PRNGKey(0)
    k_pred, k_tgt, k_w = jax.random.split(key, 3)

    # Small 3-channel images (VGG requirement), batch=2, 32x32 spatial
    # -> conv4_4 features (2, 512, 4, 4), i.e. HW=16, C=512.
    pred = jax.random.uniform(k_pred, (2, 3, 32, 32), dtype=jnp.float32)
    target = jax.random.uniform(k_tgt, (2, 3, 32, 32), dtype=jnp.float32)
    params = init_vgg_params(k_w)

    loss_fn = jax.jit(functools.partial(cobi_loss_forward,
                                        band_width=0.5, weight_sp=0.1,
                                        loss_weight=1.0))
    loss = loss_fn(params, pred, target)
    jax.block_until_ready(loss)
    assert loss.shape == () and bool(jnp.isfinite(loss))
    print("KERNEL_OK")
</pallas_src>

<mosaic_0001>
module attributes {stable_mosaic.version = 11 : i64} {
  func.func @_cobi_kernel(%arg0: i32, %arg1: i32, %arg2: memref<1x16x512xbf16, #tpu.memory_space<vmem>>, %arg3: memref<1x512x16xbf16, #tpu.memory_space<vmem>>, %arg4: memref<16x16xf32, #tpu.memory_space<vmem>>, %arg5: memref<1x1x1xf32, #tpu.memory_space<vmem>>, %arg6: memref<1x1xf32, #tpu.memory_space<vmem>>) attributes {dimension_semantics = [#tpu.dimension_semantics<parallel>, #tpu.dimension_semantics<arbitrary>], iteration_bounds = array<i64: 2, 1>, scalar_prefetch = 0 : i64, scratch_operands = 1 : i64, tpu.core_type = #tpu.core_type<tc>, window_params = [{transform_indices = @transform_0, window_bounds = array<i64: 1, 16, 512>}, {transform_indices = @transform_1, window_bounds = array<i64: 1, 512, 16>}, {transform_indices = @transform_2, window_bounds = array<i64: 16, 16>}, {transform_indices = @transform_3, window_bounds = array<i64: 1, 1, 1>}]} {
    %c0_i32 = arith.constant 0 : i32
    %0 = arith.cmpi eq, %arg1, %c0_i32 : i32
    %1 = arith.extui %0 : i1 to i32
    %c0_i32_0 = arith.constant 0 : i32
    %2 = arith.cmpi ne, %1, %c0_i32_0 : i32
    scf.if %2 {
      %cst_24 = arith.constant 0.000000e+00 : f32
      %43 = vector.broadcast %cst_24 : f32 to vector<1x1xf32>
      %c0_25 = arith.constant 0 : index
      %c0_26 = arith.constant 0 : index
      %44 = vector.load %arg6[%c0_25, %c0_26] : memref<1x1xf32, #tpu.memory_space<vmem>>, vector<1x1xf32>
      tpu.vector_store %arg6[%c0_25, %c0_26], %43 {strides = array<i32>} : memref<1x1xf32, #tpu.memory_space<vmem>>, vector<1x1xf32>,
    } else {
    }
    %c0 = arith.constant 0 : index
    %c0_1 = arith.constant 0 : index
    %c0_2 = arith.constant 0 : index
    %3 = vector.load %arg2[%c0, %c0_1, %c0_2] : memref<1x16x512xbf16, #tpu.memory_space<vmem>>, vector<1x16x512xbf16>
    %4 = vector.shape_cast %3 : vector<1x16x512xbf16> to vector<16x512xbf16>
    %c0_3 = arith.constant 0 : index
    %c0_4 = arith.constant 0 : index
    %c0_5 = arith.constant 0 : index
    %5 = vector.load %arg3[%c0_3, %c0_4, %c0_5] : memref<1x512x16xbf16, #tpu.memory_space<vmem>>, vector<1x512x16xbf16>
    %6 = vector.shape_cast %5 : vector<1x512x16xbf16> to vector<512x16xbf16>
    %c0_6 = arith.constant 0 : index
    %c0_7 = arith.constant 0 : index
    %7 = vector.load %arg4[%c0_6, %c0_7] : memref<16x16xf32, #tpu.memory_space<vmem>>, vector<16x16xf32>
    %cst = arith.constant dense<0.000000e+00> : vector<16x16xf32>
    %8 = tpu.matmul %4, %6, %cst {dimension_numbers = #tpu.dot_dimension_numbers<[1], [0], [0], [1], [0, 0, 1, 1], [], []>} : vector<16x512xbf16>, vector<512x16xbf16>, vector<16x16xf32> -> vector<16x16xf32>
    %cst_8 = arith.constant 1.000000e+00 : f32
    %9 = vector.broadcast %cst_8 : f32 to vector<16x16xf32>
    %10 = arith.subf %9, %8 : vector<16x16xf32>
    %cst_9 = arith.constant dense<0x7F800000> : vector<16xf32>
    %11 = vector.multi_reduction <minimumf>, %10, %cst_9 [1] : vector<16x16xf32> to vector<16xf32>
    %12 = vector.shape_cast %11 : vector<16xf32> to vector<16x1xf32>
    %cst_10 = arith.constant 9.99999974E-6 : f32
    %13 = vector.broadcast %cst_10 : f32 to vector<16x1xf32>
    %14 = arith.addf %12, %13 : vector<16x1xf32>
    %15 = tpu.reciprocal %14 {approx = true} : vector<16x1xf32> -> vector<16x1xf32>
    %16 = vector.broadcast %15 : vector<16x1xf32> to vector<16x16xf32>
    %17 = arith.mulf %10, %16 : vector<16x16xf32>
    %cst_11 = arith.constant 1.000000e+00 : f32
    %18 = vector.broadcast %cst_11 : f32 to vector<16x16xf32>
    %19 = arith.subf %18, %17 : vector<16x16xf32>
    %cst_12 = arith.constant 2.000000e+00 : f32
    %20 = vector.broadcast %cst_12 : f32 to vector<16x16xf32>
    %21 = arith.mulf %19, %20 : vector<16x16xf32>
    %22 = math.exp %21 : vector<16x16xf32>
    %cst_13 = arith.constant dense<0.000000e+00> : vector<16xf32>
    %23 = vector.multi_reduction <add>, %22, %cst_13 [1] : vector<16x16xf32> to vector<16xf32>
    %24 = vector.shape_cast %23 : vector<16xf32> to vector<16x1xf32>
    %25 = tpu.reciprocal %24 {approx = true} : vector<16x1xf32> -> vector<16x1xf32>
    %cst_14 = arith.constant 0.899999976 : f32
    %26 = vector.broadcast %cst_14 : f32 to vector<16x1xf32>
    %27 = arith.mulf %26, %25 : vector<16x1xf32>
    %28 = vector.broadcast %27 : vector<16x1xf32> to vector<16x16xf32>
    %29 = arith.mulf %22, %28 : vector<16x16xf32>
    %cst_15 = arith.constant 1.000000e-01 : f32
    %30 = vector.broadcast %cst_15 : f32 to vector<16x16xf32>
    %31 = arith.mulf %30, %7 : vector<16x16xf32>
    %32 = arith.addf %29, %31 : vector<16x16xf32>
    %cst_16 = arith.constant dense<0xFF800000> : vector<16xf32>
    %33 = vector.multi_reduction <maximumf>, %32, %cst_16 [1] : vector<16x16xf32> to vector<16xf32>
    %34 = vector.shape_cast %33 : vector<16xf32> to vector<16x1xf32>
    %c0_17 = arith.constant 0 : index
    %c0_18 = arith.constant 0 : index
    %35 = vector.load %arg6[%c0_17, %c0_18] : memref<1x1xf32, #tpu.memory_space<vmem>>, vector<1x1xf32>
    %cst_19 = arith.constant dense<0.000000e+00> : vector<1xf32>
    %36 = vector.multi_reduction <add>, %34, %cst_19 [0] : vector<16x1xf32> to vector<1xf32>
    %37 = vector.shape_cast %36 : vector<1xf32> to vector<1x1xf32>
    %38 = arith.addf %35, %37 : vector<1x1xf32>
    %c0_20 = arith.constant 0 : index
    %c0_21 = arith.constant 0 : index
    %39 = vector.load %arg6[%c0_20, %c0_21] : memref<1x1xf32, #tpu.memory_space<vmem>>, vector<1x1xf32>
    tpu.vector_store %arg6[%c0_20, %c0_21], %38 {strides = array<i32>} : memref<1x1xf32, #tpu.memory_space<vmem>>, vector<1x1xf32>,
    %c0_i32_22 = arith.constant 0 : i32
    %40 = arith.cmpi eq, %arg1, %c0_i32_22 : i32
    %41 = arith.extui %40 : i1 to i32
    %c0_i32_23 = arith.constant 0 : i32
    %42 = arith.cmpi ne, %41, %c0_i32_23 : i32
    scf.if %42 {
      %c0_24 = arith.constant 0 : index
      %c0_25 = arith.constant 0 : index
      %43 = vector.load %arg6[%c0_24, %c0_25] : memref<1x1xf32, #tpu.memory_space<vmem>>, vector<1x1xf32>
      %cst_26 = arith.constant 6.250000e-02 : f32
      %44 = vector.broadcast %cst_26 : f32 to vector<1x1xf32>
      %45 = arith.mulf %43, %44 : vector<1x1xf32>
      %cst_27 = arith.constant 9.99999974E-6 : f32
      %46 = vector.broadcast %cst_27 : f32 to vector<1x1xf32>
      %47 = arith.addf %45, %46 : vector<1x1xf32>
      %48 = math.log %47 : vector<1x1xf32>
      %cst_28 = arith.constant 0.000000e+00 : f32
      %49 = vector.broadcast %cst_28 : f32 to vector<1x1xf32>
      %50 = arith.subf %49, %48 : vector<1x1xf32>
      %c0_29 = arith.constant 0 : index
      %c0_30 = arith.constant 0 : index
      %c0_31 = arith.constant 0 : index
      %51 = vector.load %arg5[%c0_29, %c0_30, %c0_31] : memref<1x1x1xf32, #tpu.memory_space<vmem>>, vector<1x1x1xf32>
      %52 = vector.shape_cast %51 : vector<1x1x1xf32> to vector<1x1xf32>
      %53 = vector.shape_cast %50 : vector<1x1xf32> to vector<1x1x1xf32>
      tpu.vector_store %arg5[%c0_29, %c0_30, %c0_31], %53 {strides = array<i32>} : memref<1x1x1xf32, #tpu.memory_space<vmem>>, vector<1x1x1xf32>,
    } else {
    }
    return
  }
  func.func @transform_0(%arg0: i32, %arg1: i32) -> (i32, i32, i32) {
    %c0_i32 = arith.constant 0 : i32
    %c0_i32_0 = arith.constant 0 : i32
    return %arg0, %arg1, %c0_i32 : i32, i32, i32
  }
  func.func @transform_1(%arg0: i32, %arg1: i32) -> (i32, i32, i32) {
    %c0_i32 = arith.constant 0 : i32
    %c0_i32_0 = arith.constant 0 : i32
    %c0_i32_1 = arith.constant 0 : i32
    return %arg0, %c0_i32, %c0_i32_0 : i32, i32, i32
  }
  func.func @transform_2(%arg0: i32, %arg1: i32) -> (i32, i32) {
    %c0_i32 = arith.constant 0 : i32
    %c0_i32_0 = arith.constant 0 : i32
    return %arg1, %c0_i32 : i32, i32
  }
  func.func @transform_3(%arg0: i32, %arg1: i32) -> (i32, i32, i32) {
    %c0_i32 = arith.constant 0 : i32
    %c0_i32_0 = arith.constant 0 : i32
    %c0_i32_1 = arith.constant 0 : i32
    return %arg0, %c0_i32, %c0_i32_0 : i32, i32, i32
  }
}

</mosaic_0001>

<bundles_post_ra>
// kernel: cobi_loss_forward.1
= control target key start
LH: loop header
LB: loop body
LE: loop exit
PB: predicated region body
PF: predicated region fallthrough
CT: control target
= control target key end

     0   :  { %s985_s12 = smov 0   ;;  %s987_s13 = smov 0   ;;  %s1075_s0 = inlined_call_operand.vmem [shape: bf16[2,16,512], index: 0, kind: input, shape index: {}]   ;;  %s1076_s1 = inlined_call_operand.vmem [shape: bf16[2,512,16], index: 1, kind: input, shape index: {}]   ;;  %s1077_s2 = inlined_call_operand.vmem [shape: f32[16,16], index: 2, kind: input, shape index: {}]   ;;  %s1078_s3 = inlined_call_operand.vmem [shape: f32[2,1,1], index: 3, kind: output, shape index: {}]  }
   0x1   :  { %s989_s14 = smov 0  }
   0x2 LB: > { %s25_s15 = sadd.s32 1, %s958_s13  ;;  %p774_p0 = scmp.ge.s32.totalorder %s962_s14, 1  ;;  %s962_s14 = sphi %s989_s14, %s13_s14   ;;  %s958_s13 = sphi %s987_s13, %s1080_s13   ;;  %s954_s12 = sphi %s985_s12, %s1079_s12  }
   0x3   : > { %p27_p1 = scmp.ge.s32.totalorder %s25_s15, 2  ;;  %p178_p2 = scmp.lt.s32.totalorder %s962_s14, 3 }
   0x5   : > { %s1082_s15 = smov (%p27_p1, %s25_s15), 0  ;;  %p179_p3 = pnand %p774_p0, %p178_p2 }
   0x6   : > { %p216_p4 = scmp.lt.s32.totalorder (!%p179_p3), %s954_s12, 1  ;;  %vm613_vm0 = vcmask (!%p179_p3), 130048   ;;  %vm245_vm1 = vcmask (!%p179_p3), 0  }
   0x7   : > { %182 = sbr.rel (%p179_p3) target bundleno = 797 (0x31d), region = 32 }
   0xe   : > { %s1084_s12 = smov (!%p216_p4, %s954_s12), 1 }
   0xf   : > { %s818_s16 = sshll.u32 %s1084_s12, 8  ;;  %s817_s20 = sshll.u32 %s1084_s12, 5 }
  0x10   : > { %s1009_s19 = scalar_lea.vmem %s1076_s1, %s818_s16  ;;  %s224_s23 = scalar_lea.vmem %s1075_s0, %s817_s20 }
  0x11   : > { %v888_v0 = vld [vmem:[%s1009_s19 + $0x40] sm:$0xff]   ;;  %v892_v4 = vld [vmem:[%s1009_s19 + $0x48] sm:$0xff]   ;;  %v896_v8 = vld [vmem:[%s1009_s19 + $0x50] sm:$0xff]   ;;  %s239_s30 = scalar_lea.vmem %s1078_s3, %s1084_s12 }
  0x12   : > { %v889_v1 = vld [vmem:[%s1009_s19 + $0xc0] sm:$0xff]   ;;  %819 = vmatprep.subr.bf16.mxu0 %v888_v0  ;;  %v893_v5 = vld [vmem:[%s1009_s19 + $0xc8] sm:$0xff]   ;;  %v897_v9 = vld [vmem:[%s1009_s19 + $0xd0] sm:$0xff]  }
  0x13   : > { %v890_v2 = vld [vmem:[%s1009_s19] sm:$0xff]   ;;  %841 = vmatprep.subr.bf16.mxu1 %v889_v1  ;;  %v894_v6 = vld [vmem:[%s1009_s19 + $0x8] sm:$0xff]   ;;  %v898_v10 = vld [vmem:[%s1009_s19 + $0x10] sm:$0xff]  }
  0x14   : > { %v891_v3 = vld [vmem:[%s1009_s19 + $0x80] sm:$0xff]   ;;  %820 = vmatpush3.bf16.msra.mxu0 %v890_v2  ;;  %v895_v7 = vld [vmem:[%s1009_s19 + $0x88] sm:$0xff]   ;;  %v899_v11 = vld [vmem:[%s1009_s19 + $0x90] sm:$0xff]  }
  0x15   : > { %842 = vmatpush3.bf16.msra.mxu1 %v891_v3  ;;  %821 = vmatprep.subr.bf16.mxu0 %v892_v4  ;;  %v900_v12 = vld [vmem:[%s1009_s19 + $0x58] sm:$0xff]   ;;  %v904_v16 = vld [vmem:[%s1009_s19 + $0x60] sm:$0xff]   ;;  %v908_v20 = vld [vmem:[%s1009_s19 + $0x68] sm:$0xff]  }
  0x16   : > { %843 = vmatprep.subr.bf16.mxu1 %v893_v5  ;;  %v901_v13 = vld [vmem:[%s1009_s19 + $0xd8] sm:$0xff]   ;;  %v905_v17 = vld [vmem:[%s1009_s19 + $0xe0] sm:$0xff]   ;;  %v909_v21 = vld [vmem:[%s1009_s19 + $0xe8] sm:$0xff]  }
  0x17   : > { %v902_v14 = vld [vmem:[%s1009_s19 + $0x18] sm:$0xff]   ;;  %v906_v18 = vld [vmem:[%s1009_s19 + $0x20] sm:$0xff]   ;;  %v910_v22 = vld [vmem:[%s1009_s19 + $0x28] sm:$0xff]  }
  0x18   : > { %822 = vmatpush3.bf16.msra.mxu0 %v894_v6  ;;  %v903_v15 = vld [vmem:[%s1009_s19 + $0x98] sm:$0xff]   ;;  %v907_v19 = vld [vmem:[%s1009_s19 + $0xa0] sm:$0xff]   ;;  %v911_v23 = vld [vmem:[%s1009_s19 + $0xa8] sm:$0xff]  }
  0x19   : > { %844 = vmatpush3.bf16.msra.mxu1 %v895_v7  ;;  %823 = vmatprep.subr.bf16.mxu0 %v896_v8  ;;  %v912_v24 = vld [vmem:[%s1009_s19 + $0x70] sm:$0xff]   ;;  %v916_v28 = vld [vmem:[%s1009_s19 + $0x78] sm:$0xff]  }
  0x1a   : > { %845 = vmatprep.subr.bf16.mxu1 %v897_v9  ;;  %v913_v25 = vld [vmem:[%s1009_s19 + $0xf0] sm:$0xff]   ;;  %v917_v29 = vld [vmem:[%s1009_s19 + $0xf8] sm:$0xff]  }
  0x1b   : > { %v914_v26 = vld [vmem:[%s1009_s19 + $0x30] sm:$0xff]   ;;  %v918_v30 = vld [vmem:[%s1009_s19 + $0x38] sm:$0xff]  }
  0x1c   : > { %824 = vmatpush3.bf16.msra.mxu0 %v898_v10  ;;  %v915_v27 = vld [vmem:[%s1009_s19 + $0xb0] sm:$0xff]   ;;  %v919_v31 = vld [vmem:[%s1009_s19 + $0xb8] sm:$0xff]   ;;  %v315_v10 = vld [vmem:[%s1077_s2] sm:$0xff] }
  0x1d   : > { %846 = vmatpush3.bf16.msra.mxu1 %v899_v11  ;;  %825 = vmatprep.subr.bf16.mxu0 %v900_v12  ;;  %v920_v32 = vld [vmem:[%s224_s23] ss:$16 sps:$4 sm:$0xff]   ;;  %v922_v33 = vld [vmem:[%s224_s23 + $0x4] ss:$16 sps:$4 sm:$0xff]   ;;  %v923_v34 = vld [vmem:[%s224_s23 + $0x8] ss:$16 sps:$4 sm:$0xff]  }
  0x1e   : > { %847 = vmatprep.subr.bf16.mxu1 %v901_v13  ;;  %v925_v35 = vld [vmem:[%s224_s23 + $0xc] ss:$16 sps:$4 sm:$0xff]   ;;  %561 = vmatprep.mubr.bf16.mxu0 %v922_v33  ;;  %v646_v13 = vmul.f32 0.1, %v315_v10 }
  0x1f   : > { %602 = vmatprep.mubr.bf16.mxu1 %v925_v35 }
  0x20   : > { %826 = vmatpush3.bf16.msra.mxu0 %v902_v14  ;;  %v316_v14 = vld [vmem:[%s1077_s2 + $0x8] sm:$0xff] }
  0x21   : > { %848 = vmatpush3.bf16.msra.mxu1 %v903_v15  ;;  %827 = vmatprep.subr.bf16.mxu0 %v904_v16 }
  0x22   : > { %849 = vmatprep.subr.bf16.mxu1 %v905_v17 }
  0x24   : > { %828 = vmatpush3.bf16.msra.mxu0 %v906_v18 }
  0x25   : > { %850 = vmatpush3.bf16.msra.mxu1 %v907_v19  ;;  %829 = vmatprep.subr.bf16.mxu0 %v908_v20  ;;  %v647_v19 = vmul.f32 0.1, %v316_v14 }
  0x26   : > { %851 = vmatprep.subr.bf16.mxu1 %v909_v21 }
  0x28   : > { %830 = vmatpush3.bf16.msra.mxu0 %v910_v22 }
  0x29   : > { %852 = vmatpush3.bf16.msra.mxu1 %v911_v23  ;;  %831 = vmatprep.subr.bf16.mxu0 %v912_v24  ;;  %v964_v24 = vmov 0.0  }
  0x2a   : > { %853 = vmatprep.subr.bf16.mxu1 %v913_v25  ;;  %246 = vst.msk [vmem:[#allocation2] sm:$0x1] %vm245_vm1, %v964_v24 }
  0x2c   : > { %832 = vmatpush3.bf16.msra.mxu0 %v914_v26 }
  0x2d   : > { %854 = vmatpush3.bf16.msra.mxu1 %v915_v27  ;;  %833 = vmatprep.subr.bf16.mxu0 %v916_v28 }
  0x2e   : > { %855 = vmatprep.subr.bf16.mxu1 %v917_v29 }
  0x30   : > { %834 = vmatpush3.bf16.msra.mxu0 %v918_v30 }
  0x31   : > { %856 = vmatpush3.bf16.msra.mxu1 %v919_v31  ;;  %v656_v33 = vld [vmem:[#allocation2] sm:$0x1] }
  0x33   : > { %562 = vmatmul.mubr.bf16.vlgmr.msra.gmra.mrb[0].mxu0 %v920_v32 }
  0x34   : > { %603 = vmatmul.mubr.bf16.vlgmr.msra.gmra.mrb[0].mxu1 %v923_v34 }
 0x106   : > { %v835_v36 = vpop.f32.mrb[0].mxu0 }
 0x107   : > { %v857_v37 = vpop.f32.mrb[0].mxu1  ;;  %v836_v38 = vpop.f32.mrb[1].mxu0 }
 0x108   : > { %v837_v39 = vadd.f32 %v836_v38, %v835_v36  ;;  %v858_v40 = vpop.f32.mrb[1].mxu1  ;;  %v838_v41 = vpop.f32.mrb[2].mxu0 }
 0x109   : > { %v859_v42 = vadd.f32 %v858_v40, %v857_v37  ;;  %v860_v43 = vpop.f32.mrb[2].mxu1  ;;  %v839_v44 = vpop.f32.mrb[3].mxu0 }
 0x10a   : > { %v840_v45 = vadd.f32 %v839_v44, %v838_v41  ;;  %v861_v46 = vpop.f32.mrb[3].mxu1 }
 0x10b   : > { %v862_v47 = vadd.f32 %v861_v46, %v860_v43  ;;  %v605_v48 = vadd.f32 %v859_v42, %v837_v39 }
 0x10d   : > { %v608_v49 = vadd.f32 %v862_v47, %v840_v45  ;;  %v611_v50 = vsub.f32 1.0, %v605_v48 }
 0x10f   : > { %v614_v51 = vsel %vm613_vm0, %v611_v50, inf  ;;  %v612_v52 = vsub.f32 1.0, %v608_v49 }
 0x110   : > { %615 = vmin.xlane.f32.xlu0 %v614_v51 }
 0x111   : > { %v617_v53 = vsel %vm613_vm0, %v612_v52, inf }
 0x114   : > { %618 = vmin.xlane.f32.xlu0 %v617_v53 }
 0x19d   : > { %v616_v54 = vpop.xlane.xlu0 %615 }
 0x19e   : > { %v620_v55 = vadd.f32 1e-05, %v616_v54 }
 0x1a0   : > { %926 = vrcp.f32 %v620_v55 }
 0x1a1   : > { %v619_v56 = vpop.xlane.xlu0 %618 }
 0x1a2   : > { %v621_v57 = vadd.f32 1e-05, %v619_v56 }
 0x1a4   : > { %928 = vrcp.f32 %v621_v57 }
 0x1aa   : > { %v927_v58 = vpop.eup %926 }
 0x1ab   : > { %v624_v59 = vmul.f32 %v927_v58, %v611_v50 }
 0x1ad   : > { %v626_v60 = vsub.f32 1.0, %v624_v59 }
 0x1ae   : > { %v929_v61 = vpop.eup %928 }
 0x1af   : > { %v625_v62 = vmul.f32 %v929_v61, %v612_v52  ;;  %v628_v63 = vmul.f32 2.0, %v626_v60 }
 0x1b1   : > { %v627_v0 = vsub.f32 1.0, %v625_v62  ;;  %v630_v1 = vmul.f32 1.442695, %v628_v63 }
 0x1b3   : > { %930 = vpow2.f32 %v630_v1  ;;  %v629_v2 = vmul.f32 2.0, %v627_v0 }
 0x1b5   : > { %v632_v3 = vmul.f32 1.442695, %v629_v2 }
 0x1b7   : > { %932 = vpow2.f32 %v632_v3 }
 0x1bd   : > { %v931_v4 = vpop.eup %930 }
 0x1be   : > { %v634_v5 = vsel %vm613_vm0, %v931_v4, 0.0 }
 0x1bf   : > { %635 = vadd.xlane.f32.xlu1 %v634_v5 }
 0x1c1   : > { %v933_v6 = vpop.eup %932 }
 0x1c2   : > { %v637_v7 = vsel %vm613_vm0, %v933_v6, 0.0 }
 0x1c3   : > { %638 = vadd.xlane.f32.xlu1 %v637_v7 }
 0x24c   : > { %v636_v8 = vpop.xlane.xlu1 %635 }
 0x24d   : > { %934 = vrcp.f32 %v636_v8 }
 0x250   : > { %v639_v9 = vpop.xlane.xlu1 %638 }
 0x251   : > { %936 = vrcp.f32 %v639_v9 }
 0x257   : > { %v935_v11 = vpop.eup %934 }
 0x258   : > { %v642_v12 = vmul.f32 0.9, %v935_v11 }
 0x25a   : > { %v644_v15 = vmul.f32 %v931_v4, %v642_v12 }
 0x25b   : > { %v937_v16 = vpop.eup %936 }
 0x25c   : > { %v643_v17 = vmul.f32 0.9, %v937_v16  ;;  %v648_v18 = vadd.f32 %v646_v13, %v644_v15 }
 0x25e   : > { %v650_v20 = vsel %vm613_vm0, %v648_v18, -inf  ;;  %v645_v21 = vmul.f32 %v933_v6, %v643_v17 }
 0x25f   : > { %651 = vmax.xlane.f32.xlu0 %v650_v20 }
 0x260   : > { %v649_v22 = vadd.f32 %v647_v19, %v645_v21 }
 0x262   : > { %v653_v23 = vsel %vm613_vm0, %v649_v22, -inf }
 0x263   : > { %654 = vmax.xlane.f32.xlu1 %v653_v23 }
 0x2ec   : > { %v652_v25 = vpop.xlane.xlu0 %651 }
 0x2f0   : > { %v655_v26 = vpop.xlane.xlu1 %654 }
 0x2f1   : > { %v657_v27 = vadd.f32 %v655_v26, %v652_v25 }
 0x2f3   : > { %v658_v28 = vrot.slane %v657_v27, 4 }
 0x2f5   : > { %v659_v29 = vadd.f32 %v658_v28, %v657_v27 }
 0x2f7   : > { %v660_v30 = vrot.slane %v659_v29, 2 }
 0x2f9   : > { %v661_v31 = vadd.f32 %v660_v30, %v659_v29 }
 0x2fb   : > { %v662_v32 = vrot.slane %v661_v31, 1 }
 0x2fd   : > { %v663_v34 = vadd.f32 %v662_v32, %v661_v31 }
 0x2ff   : > { %v664_v35 = vadd.f32 %v663_v34, %v656_v33 }
 0x301   : > { %666 = vst.msk [vmem:[#allocation2] sm:$0x1] %vm245_vm1, %v664_v35 }
 0x308   : > { %v670_v36 = vld [vmem:[#allocation2] sm:$0x1] }
 0x309   : > { %v671_v37 = vmul.f32 0.0625, %v670_v36 }
 0x30b   : > { %v672_v38 = vadd.f32 1e-05, %v671_v37 }
 0x30d   : > { %938 = vlog2.f32 %v672_v38 }
 0x317   : > { %v939_v39 = vpop.eup %938 }
 0x318   : > { %v674_v40 = vmul.f32 0.6931472, %v939_v39 }
 0x31a   : > { %v675_v41 = vsub.f32 0.0, %v674_v40 }
 0x31c   : > { %676 = vst.msk [vmem:[%s239_s30] sm:$0x1] %vm245_vm1, %v675_v41 }
 0x31d PF: > { %s13_s14 = sadd.s32 1, %s962_s14   ;;  %s1079_s12 = smov %s958_s13 }
 0x31e   : > { %p10_p5 = scmp.ge.s32.totalorder %s13_s14, 4   ;;  %s1080_s13 = smov %s1082_s15 }
 0x320   :  { %12 = sbr.rel (!%p10_p5) target bundleno = 2 (0x2), region = 76 }

</bundles_post_ra>
